<compile_context>
chip_gen: v6e
topology: v6e:2x2x1
jax: 0.10.0
libtpu: 0.0.40
codegen_flags: <defaults>
</compile_context>

<pallas_src>
import functools

import jax
import jax.numpy as jnp
import numpy as np
from jax.experimental import pallas as pl
from jax.experimental.pallas import tpu as pltpu


def _lstmx1_kernel(seq_len, batch_pad, hidden_size,
                   x_ref, w_ih_ref, w_hh_ref, b_ref, w_out_ref, b_out_ref,
                   o_ref):
    """Refs:
         x_ref     (T*Bp, D)   time-major, batch zero-padded to Bp=8 sublanes
         w_ih_ref  (D, 4H)     layer-0 input weights, gate cols [i, f, o, g]
         w_hh_ref  (H, 4H)     layer-0 recurrent weights, gate cols [i, f, o, g]
         b_ref     (1, 4H)     fused (b_ih + b_hh), gate cols [i, f, o, g]
         w_out_ref (H, out)    output Linear weights (transposed)
         b_out_ref (1, out)
         o_ref     (Bp, out)   output (first B rows are the real batch)
    """
    T, Bp, H = seq_len, batch_pad, hidden_size

    w_ih = w_ih_ref[...]            # hoisted loads (time loop is unrolled)
    w_hh = w_hh_ref[...]
    b = b_ref[...]

    # One batched MXU call for the whole sequence's input projection; the
    # fused bias is added exactly once here.
    x_all = x_ref[...]                                               # (T*Bp, D)
    xp = jnp.dot(x_all, w_ih, preferred_element_type=jnp.float32) + b  # (T*Bp, 4H)

    h = jnp.zeros((Bp, H), jnp.float32)
    c = jnp.zeros((Bp, H), jnp.float32)
    for t in range(T):                          # fully unrolled (T is small)
        # Aligned single-vreg slice (rows t*8 .. t*8+7), no sublane shuffle.
        gates = xp[t * Bp:(t + 1) * Bp, :] + jnp.dot(
            h, w_hh, preferred_element_type=jnp.float32)            # (Bp, 4H)
        # Gate order [i, f, o, g]: sigmoid on the first 3H lanes only,
        # tanh on the last H lanes only.
        sig = jax.nn.sigmoid(gates[:, :3 * H])
        g_g = jnp.tanh(gates[:, 3 * H:])
        i_g = sig[:, 0 * H:1 * H]
        f_g = sig[:, 1 * H:2 * H]
        o_g = sig[:, 2 * H:3 * H]
        c = f_g * c + i_g * g_g
        h = o_g * jnp.tanh(c)
    # h == PyTorch hidden_state[0] (layer-0 final hidden), padded to Bp rows.

    # Output projection: Linear(hidden_state[0]).  Tiny one-time write.
    o_ref[...] = (jnp.dot(h, w_out_ref[...],
                          preferred_element_type=jnp.float32)
                  + b_out_ref[...])


def prepare_params(params, *, hidden_size, output_dim):
    """One-time host-side weight prep: only LAYER 0 + output Linear are needed
    (hidden_state[0] does not depend on the upper layers).  Transpose, fuse
    biases, and permute gate columns from PyTorch's [i, f, g, o] to
    [i, f, o, g]."""
    H = hidden_size
    perm = np.concatenate([np.arange(0, H), np.arange(H, 2 * H),
                           np.arange(3 * H, 4 * H), np.arange(2 * H, 3 * H)])
    w_ih, w_hh, b_ih, b_hh = params["layers"][0]
    w_ih_T = jnp.transpose(w_ih)[:, perm]                  # (D, 4H)
    w_hh_T = jnp.transpose(w_hh)[:, perm]                  # (H, 4H)
    b0 = (b_ih + b_hh)[perm].reshape(1, 4 * H)             # (1, 4H)
    w_out_T = jnp.transpose(params["w_out"])               # (H, out)
    b_out = params["b_out"].reshape(1, output_dim)         # (1, out)
    return [w_ih_T, w_hh_T, b0, w_out_T, b_out]


def lstmx1_forward(x, prepped_params, *, hidden_size, output_dim):
    """x: (batch, seq, input_dim) float32, like PyTorch batch_first=True."""
    B, T, D = x.shape
    Bp = ((B + 7) // 8) * 8          # pad batch to a full sublane group (8)
    # Time-major + batch padding so every per-step slice is one aligned vreg.
    x_tm = jnp.transpose(x, (1, 0, 2))                     # (T, B, D)
    x_pad = jnp.pad(x_tm, ((0, 0), (0, Bp - B), (0, 0)))   # (T, Bp, D)
    x_flat = x_pad.reshape(T * Bp, D)

    kernel = functools.partial(_lstmx1_kernel, T, Bp, hidden_size)
    vmem_spec = pl.BlockSpec(memory_space=pltpu.MemorySpace.VMEM)
    n_inputs = 1 + len(prepped_params)

    # Single invocation (no grid): sequence + layer-0 weights (a few KB) live
    # in VMEM for the whole kernel on every TPU generation.
    out_pad = pl.pallas_call(
        kernel,
        out_shape=jax.ShapeDtypeStruct((Bp, output_dim), jnp.float32),
        in_specs=[vmem_spec] * n_inputs,
        out_specs=vmem_spec,
    )(x_flat, *prepped_params)
    return out_pad[:B]


def init_params(key, input_dim, hidden_size, num_layers, output_dim):
    """Deterministic init mimicking PyTorch's U(-1/sqrt(H), 1/sqrt(H))."""
    H = hidden_size
    bound = 1.0 / jnp.sqrt(jnp.float32(H))
    layers = []
    for l in range(num_layers):
        in_l = input_dim if l == 0 else H
        key, k1, k2, k3, k4 = jax.random.split(key, 5)
        w_ih = jax.random.uniform(k1, (4 * H, in_l), jnp.float32, -bound, bound)
        w_hh = jax.random.uniform(k2, (4 * H, H), jnp.float32, -bound, bound)
        b_ih = jax.random.uniform(k3, (4 * H,), jnp.float32, -bound, bound)
        b_hh = jax.random.uniform(k4, (4 * H,), jnp.float32, -bound, bound)
        layers.append((w_ih, w_hh, b_ih, b_hh))
    key, k5, k6 = jax.random.split(key, 3)
    w_out = jax.random.uniform(k5, (output_dim, H), jnp.float32, -bound, bound)
    b_out = jax.random.uniform(k6, (output_dim,), jnp.float32, -bound, bound)
    return {"layers": layers, "w_out": w_out, "b_out": b_out}


def lstmx1_reference(x, params, *, num_layers, hidden_size):
    """Pure-JAX reference matching torch.nn.LSTM (ALL layers, original gate
    order) + Linear on hidden_state[0]."""
    B, T, D = x.shape
    H = hidden_size
    hs = [jnp.zeros((B, H), jnp.float32) for _ in range(num_layers)]
    cs = [jnp.zeros((B, H), jnp.float32) for _ in range(num_layers)]
    for t in range(T):
        inp = x[:, t, :]
        for l in range(num_layers):
            w_ih, w_hh, b_ih, b_hh = params["layers"][l]
            gates = inp @ w_ih.T + b_ih + hs[l] @ w_hh.T + b_hh
            i_g = jax.nn.sigmoid(gates[:, 0 * H:1 * H])
            f_g = jax.nn.sigmoid(gates[:, 1 * H:2 * H])
            g_g = jnp.tanh(gates[:, 2 * H:3 * H])
            o_g = jax.nn.sigmoid(gates[:, 3 * H:4 * H])
            cs[l] = f_g * cs[l] + i_g * g_g
            hs[l] = o_g * jnp.tanh(cs[l])
            inp = hs[l]
    return hs[0] @ params["w_out"].T + params["b_out"]


if __name__ == "__main__":
    batch = 2
    seq = 8
    input_dim = 8
    hidden_size = 32   # 4H = 128 -> gate vector fills one lane width exactly
    num_layers = 2
    output_dim = 4

    key = jax.random.PRNGKey(0)
    key, kx = jax.random.split(key)
    x = jax.random.normal(kx, (batch, seq, input_dim), jnp.float32)
    params = init_params(key, input_dim, hidden_size, num_layers, output_dim)

    # One-time weight prep (layer-0 transpose / gate permute / bias fuse).
    prepped = prepare_params(params, hidden_size=hidden_size,
                             output_dim=output_dim)

    out = lstmx1_forward(x, prepped, hidden_size=hidden_size,
                         output_dim=output_dim)
    out = jax.block_until_ready(out)

    ref = lstmx1_reference(x, params, num_layers=num_layers,
                           hidden_size=hidden_size)
    np.testing.assert_allclose(np.asarray(out), np.asarray(ref),
                               rtol=1e-5, atol=1e-5)
    print("KERNEL_OK")
</pallas_src>

<mosaic_0001>
module attributes {stable_mosaic.version = 11 : i64} {
  func.func @_lstmx1_kernel(%arg0: memref<64x8xf32, #tpu.memory_space<vmem>>, %arg1: memref<8x128xf32, #tpu.memory_space<vmem>>, %arg2: memref<32x128xf32, #tpu.memory_space<vmem>>, %arg3: memref<1x128xf32, #tpu.memory_space<vmem>>, %arg4: memref<32x4xf32, #tpu.memory_space<vmem>>, %arg5: memref<1x4xf32, #tpu.memory_space<vmem>>, %arg6: memref<8x4xf32, #tpu.memory_space<vmem>>) attributes {dimension_semantics = [], scalar_prefetch = 0 : i64, scratch_operands = 0 : i64, tpu.core_type = #tpu.core_type<tc>} {
    %c0 = arith.constant 0 : index
    %c0_0 = arith.constant 0 : index
    %0 = vector.load %arg1[%c0, %c0_0] : memref<8x128xf32, #tpu.memory_space<vmem>>, vector<8x128xf32>
    %c0_1 = arith.constant 0 : index
    %c0_2 = arith.constant 0 : index
    %1 = vector.load %arg2[%c0_1, %c0_2] : memref<32x128xf32, #tpu.memory_space<vmem>>, vector<32x128xf32>
    %c0_3 = arith.constant 0 : index
    %c0_4 = arith.constant 0 : index
    %2 = vector.load %arg3[%c0_3, %c0_4] : memref<1x128xf32, #tpu.memory_space<vmem>>, vector<1x128xf32>
    %c0_5 = arith.constant 0 : index
    %c0_6 = arith.constant 0 : index
    %3 = vector.load %arg0[%c0_5, %c0_6] : memref<64x8xf32, #tpu.memory_space<vmem>>, vector<64x8xf32>
    %cst = arith.constant dense<0.000000e+00> : vector<64x128xf32>
    %4 = tpu.matmul %3, %0, %cst {dimension_numbers = #tpu.dot_dimension_numbers<[1], [0], [0], [1], [0, 0, 1, 1], [], []>} : vector<64x8xf32>, vector<8x128xf32>, vector<64x128xf32> -> vector<64x128xf32>
    %5 = vector.broadcast %2 : vector<1x128xf32> to vector<64x128xf32>
    %6 = arith.addf %4, %5 : vector<64x128xf32>
    %cst_7 = arith.constant 0.000000e+00 : f32
    %7 = vector.broadcast %cst_7 : f32 to vector<8x32xf32>
    %cst_8 = arith.constant 0.000000e+00 : f32
    %8 = vector.broadcast %cst_8 : f32 to vector<8x32xf32>
    %9 = vector.extract_strided_slice %6 {offsets = [0, 0], sizes = [8, 128], strides = [1, 1]} : vector<64x128xf32> to vector<8x128xf32>
    %cst_9 = arith.constant dense<0.000000e+00> : vector<8x128xf32>
    %10 = tpu.matmul %7, %1, %cst_9 {dimension_numbers = #tpu.dot_dimension_numbers<[1], [0], [0], [1], [0, 0, 1, 1], [], []>} : vector<8x32xf32>, vector<32x128xf32>, vector<8x128xf32> -> vector<8x128xf32>
    %11 = arith.addf %9, %10 : vector<8x128xf32>
    %12 = vector.extract_strided_slice %11 {offsets = [0, 0], sizes = [8, 96], strides = [1, 1]} : vector<8x128xf32> to vector<8x96xf32>
    %13 = arith.negf %12 : vector<8x96xf32>
    %14 = math.exp %13 : vector<8x96xf32>
    %cst_10 = arith.constant 1.000000e+00 : f32
    %15 = vector.broadcast %cst_10 : f32 to vector<8x96xf32>
    %16 = arith.addf %15, %14 : vector<8x96xf32>
    %17 = arith.divf %15, %16 : vector<8x96xf32>
    %18 = vector.extract_strided_slice %11 {offsets = [0, 96], sizes = [8, 32], strides = [1, 1]} : vector<8x128xf32> to vector<8x32xf32>
    %19 = math.tanh %18 : vector<8x32xf32>
    %20 = vector.extract_strided_slice %17 {offsets = [0, 0], sizes = [8, 32], strides = [1, 1]} : vector<8x96xf32> to vector<8x32xf32>
    %21 = vector.extract_strided_slice %17 {offsets = [0, 32], sizes = [8, 32], strides = [1, 1]} : vector<8x96xf32> to vector<8x32xf32>
    %22 = vector.extract_strided_slice %17 {offsets = [0, 64], sizes = [8, 32], strides = [1, 1]} : vector<8x96xf32> to vector<8x32xf32>
    %23 = arith.mulf %21, %8 : vector<8x32xf32>
    %24 = arith.mulf %20, %19 : vector<8x32xf32>
    %25 = arith.addf %23, %24 : vector<8x32xf32>
    %26 = math.tanh %25 : vector<8x32xf32>
    %27 = arith.mulf %22, %26 : vector<8x32xf32>
    %28 = vector.extract_strided_slice %6 {offsets = [8, 0], sizes = [8, 128], strides = [1, 1]} : vector<64x128xf32> to vector<8x128xf32>
    %cst_11 = arith.constant dense<0.000000e+00> : vector<8x128xf32>
    %29 = tpu.matmul %27, %1, %cst_11 {dimension_numbers = #tpu.dot_dimension_numbers<[1], [0], [0], [1], [0, 0, 1, 1], [], []>} : vector<8x32xf32>, vector<32x128xf32>, vector<8x128xf32> -> vector<8x128xf32>
    %30 = arith.addf %28, %29 : vector<8x128xf32>
    %31 = vector.extract_strided_slice %30 {offsets = [0, 0], sizes = [8, 96], strides = [1, 1]} : vector<8x128xf32> to vector<8x96xf32>
    %32 = arith.negf %31 : vector<8x96xf32>
    %33 = math.exp %32 : vector<8x96xf32>
    %cst_12 = arith.constant 1.000000e+00 : f32
    %34 = vector.broadcast %cst_12 : f32 to vector<8x96xf32>
    %35 = arith.addf %34, %33 : vector<8x96xf32>
    %36 = arith.divf %34, %35 : vector<8x96xf32>
    %37 = vector.extract_strided_slice %30 {offsets = [0, 96], sizes = [8, 32], strides = [1, 1]} : vector<8x128xf32> to vector<8x32xf32>
    %38 = math.tanh %37 : vector<8x32xf32>
    %39 = vector.extract_strided_slice %36 {offsets = [0, 0], sizes = [8, 32], strides = [1, 1]} : vector<8x96xf32> to vector<8x32xf32>
    %40 = vector.extract_strided_slice %36 {offsets = [0, 32], sizes = [8, 32], strides = [1, 1]} : vector<8x96xf32> to vector<8x32xf32>
    %41 = vector.extract_strided_slice %36 {offsets = [0, 64], sizes = [8, 32], strides = [1, 1]} : vector<8x96xf32> to vector<8x32xf32>
    %42 = arith.mulf %40, %25 : vector<8x32xf32>
    %43 = arith.mulf %39, %38 : vector<8x32xf32>
    %44 = arith.addf %42, %43 : vector<8x32xf32>
    %45 = math.tanh %44 : vector<8x32xf32>
    %46 = arith.mulf %41, %45 : vector<8x32xf32>
    %47 = vector.extract_strided_slice %6 {offsets = [16, 0], sizes = [8, 128], strides = [1, 1]} : vector<64x128xf32> to vector<8x128xf32>
    %cst_13 = arith.constant dense<0.000000e+00> : vector<8x128xf32>
    %48 = tpu.matmul %46, %1, %cst_13 {dimension_numbers = #tpu.dot_dimension_numbers<[1], [0], [0], [1], [0, 0, 1, 1], [], []>} : vector<8x32xf32>, vector<32x128xf32>, vector<8x128xf32> -> vector<8x128xf32>
    %49 = arith.addf %47, %48 : vector<8x128xf32>
    %50 = vector.extract_strided_slice %49 {offsets = [0, 0], sizes = [8, 96], strides = [1, 1]} : vector<8x128xf32> to vector<8x96xf32>
    %51 = arith.negf %50 : vector<8x96xf32>
    %52 = math.exp %51 : vector<8x96xf32>
    %cst_14 = arith.constant 1.000000e+00 : f32
    %53 = vector.broadcast %cst_14 : f32 to vector<8x96xf32>
    %54 = arith.addf %53, %52 : vector<8x96xf32>
    %55 = arith.divf %53, %54 : vector<8x96xf32>
    %56 = vector.extract_strided_slice %49 {offsets = [0, 96], sizes = [8, 32], strides = [1, 1]} : vector<8x128xf32> to vector<8x32xf32>
    %57 = math.tanh %56 : vector<8x32xf32>
    %58 = vector.extract_strided_slice %55 {offsets = [0, 0], sizes = [8, 32], strides = [1, 1]} : vector<8x96xf32> to vector<8x32xf32>
    %59 = vector.extract_strided_slice %55 {offsets = [0, 32], sizes = [8, 32], strides = [1, 1]} : vector<8x96xf32> to vector<8x32xf32>
    %60 = vector.extract_strided_slice %55 {offsets = [0, 64], sizes = [8, 32], strides = [1, 1]} : vector<8x96xf32> to vector<8x32xf32>
    %61 = arith.mulf %59, %44 : vector<8x32xf32>
    %62 = arith.mulf %58, %57 : vector<8x32xf32>
    %63 = arith.addf %61, %62 : vector<8x32xf32>
    %64 = math.tanh %63 : vector<8x32xf32>
    %65 = arith.mulf %60, %64 : vector<8x32xf32>
    %66 = vector.extract_strided_slice %6 {offsets = [24, 0], sizes = [8, 128], strides = [1, 1]} : vector<64x128xf32> to vector<8x128xf32>
    %cst_15 = arith.constant dense<0.000000e+00> : vector<8x128xf32>
    %67 = tpu.matmul %65, %1, %cst_15 {dimension_numbers = #tpu.dot_dimension_numbers<[1], [0], [0], [1], [0, 0, 1, 1], [], []>} : vector<8x32xf32>, vector<32x128xf32>, vector<8x128xf32> -> vector<8x128xf32>
    %68 = arith.addf %66, %67 : vector<8x128xf32>
    %69 = vector.extract_strided_slice %68 {offsets = [0, 0], sizes = [8, 96], strides = [1, 1]} : vector<8x128xf32> to vector<8x96xf32>
    %70 = arith.negf %69 : vector<8x96xf32>
    %71 = math.exp %70 : vector<8x96xf32>
    %cst_16 = arith.constant 1.000000e+00 : f32
    %72 = vector.broadcast %cst_16 : f32 to vector<8x96xf32>
    %73 = arith.addf %72, %71 : vector<8x96xf32>
    %74 = arith.divf %72, %73 : vector<8x96xf32>
    %75 = vector.extract_strided_slice %68 {offsets = [0, 96], sizes = [8, 32], strides = [1, 1]} : vector<8x128xf32> to vector<8x32xf32>
    %76 = math.tanh %75 : vector<8x32xf32>
    %77 = vector.extract_strided_slice %74 {offsets = [0, 0], sizes = [8, 32], strides = [1, 1]} : vector<8x96xf32> to vector<8x32xf32>
    %78 = vector.extract_strided_slice %74 {offsets = [0, 32], sizes = [8, 32], strides = [1, 1]} : vector<8x96xf32> to vector<8x32xf32>
    %79 = vector.extract_strided_slice %74 {offsets = [0, 64], sizes = [8, 32], strides = [1, 1]} : vector<8x96xf32> to vector<8x32xf32>
    %80 = arith.mulf %78, %63 : vector<8x32xf32>
    %81 = arith.mulf %77, %76 : vector<8x32xf32>
    %82 = arith.addf %80, %81 : vector<8x32xf32>
    %83 = math.tanh %82 : vector<8x32xf32>
    %84 = arith.mulf %79, %83 : vector<8x32xf32>
    %85 = vector.extract_strided_slice %6 {offsets = [32, 0], sizes = [8, 128], strides = [1, 1]} : vector<64x128xf32> to vector<8x128xf32>
    %cst_17 = arith.constant dense<0.000000e+00> : vector<8x128xf32>
    %86 = tpu.matmul %84, %1, %cst_17 {dimension_numbers = #tpu.dot_dimension_numbers<[1], [0], [0], [1], [0, 0, 1, 1], [], []>} : vector<8x32xf32>, vector<32x128xf32>, vector<8x128xf32> -> vector<8x128xf32>
    %87 = arith.addf %85, %86 : vector<8x128xf32>
    %88 = vector.extract_strided_slice %87 {offsets = [0, 0], sizes = [8, 96], strides = [1, 1]} : vector<8x128xf32> to vector<8x96xf32>
    %89 = arith.negf %88 : vector<8x96xf32>
    %90 = math.exp %89 : vector<8x96xf32>
    %cst_18 = arith.constant 1.000000e+00 : f32
    %91 = vector.broadcast %cst_18 : f32 to vector<8x96xf32>
    %92 = arith.addf %91, %90 : vector<8x96xf32>
    %93 = arith.divf %91, %92 : vector<8x96xf32>
    %94 = vector.extract_strided_slice %87 {offsets = [0, 96], sizes = [8, 32], strides = [1, 1]} : vector<8x128xf32> to vector<8x32xf32>
    %95 = math.tanh %94 : vector<8x32xf32>
    %96 = vector.extract_strided_slice %93 {offsets = [0, 0], sizes = [8, 32], strides = [1, 1]} : vector<8x96xf32> to vector<8x32xf32>
    %97 = vector.extract_strided_slice %93 {offsets = [0, 32], sizes = [8, 32], strides = [1, 1]} : vector<8x96xf32> to vector<8x32xf32>
    %98 = vector.extract_strided_slice %93 {offsets = [0, 64], sizes = [8, 32], strides = [1, 1]} : vector<8x96xf32> to vector<8x32xf32>
    %99 = arith.mulf %97, %82 : vector<8x32xf32>
    %100 = arith.mulf %96, %95 : vector<8x32xf32>
    %101 = arith.addf %99, %100 : vector<8x32xf32>
    %102 = math.tanh %101 : vector<8x32xf32>
    %103 = arith.mulf %98, %102 : vector<8x32xf32>
    %104 = vector.extract_strided_slice %6 {offsets = [40, 0], sizes = [8, 128], strides = [1, 1]} : vector<64x128xf32> to vector<8x128xf32>
    %cst_19 = arith.constant dense<0.000000e+00> : vector<8x128xf32>
    %105 = tpu.matmul %103, %1, %cst_19 {dimension_numbers = #tpu.dot_dimension_numbers<[1], [0], [0], [1], [0, 0, 1, 1], [], []>} : vector<8x32xf32>, vector<32x128xf32>, vector<8x128xf32> -> vector<8x128xf32>
    %106 = arith.addf %104, %105 : vector<8x128xf32>
    %107 = vector.extract_strided_slice %106 {offsets = [0, 0], sizes = [8, 96], strides = [1, 1]} : vector<8x128xf32> to vector<8x96xf32>
    %108 = arith.negf %107 : vector<8x96xf32>
    %109 = math.exp %108 : vector<8x96xf32>
    %cst_20 = arith.constant 1.000000e+00 : f32
    %110 = vector.broadcast %cst_20 : f32 to vector<8x96xf32>
    %111 = arith.addf %110, %109 : vector<8x96xf32>
    %112 = arith.divf %110, %111 : vector<8x96xf32>
    %113 = vector.extract_strided_slice %106 {offsets = [0, 96], sizes = [8, 32], strides = [1, 1]} : vector<8x128xf32> to vector<8x32xf32>
    %114 = math.tanh %113 : vector<8x32xf32>
    %115 = vector.extract_strided_slice %112 {offsets = [0, 0], sizes = [8, 32], strides = [1, 1]} : vector<8x96xf32> to vector<8x32xf32>
    %116 = vector.extract_strided_slice %112 {offsets = [0, 32], sizes = [8, 32], strides = [1, 1]} : vector<8x96xf32> to vector<8x32xf32>
    %117 = vector.extract_strided_slice %112 {offsets = [0, 64], sizes = [8, 32], strides = [1, 1]} : vector<8x96xf32> to vector<8x32xf32>
    %118 = arith.mulf %116, %101 : vector<8x32xf32>
    %119 = arith.mulf %115, %114 : vector<8x32xf32>
    %120 = arith.addf %118, %119 : vector<8x32xf32>
    %121 = math.tanh %120 : vector<8x32xf32>
    %122 = arith.mulf %117, %121 : vector<8x32xf32>
    %123 = vector.extract_strided_slice %6 {offsets = [48, 0], sizes = [8, 128], strides = [1, 1]} : vector<64x128xf32> to vector<8x128xf32>
    %cst_21 = arith.constant dense<0.000000e+00> : vector<8x128xf32>
    %124 = tpu.matmul %122, %1, %cst_21 {dimension_numbers = #tpu.dot_dimension_numbers<[1], [0], [0], [1], [0, 0, 1, 1], [], []>} : vector<8x32xf32>, vector<32x128xf32>, vector<8x128xf32> -> vector<8x128xf32>
    %125 = arith.addf %123, %124 : vector<8x128xf32>
    %126 = vector.extract_strided_slice %125 {offsets = [0, 0], sizes = [8, 96], strides = [1, 1]} : vector<8x128xf32> to vector<8x96xf32>
    %127 = arith.negf %126 : vector<8x96xf32>
    %128 = math.exp %127 : vector<8x96xf32>
    %cst_22 = arith.constant 1.000000e+00 : f32
    %129 = vector.broadcast %cst_22 : f32 to vector<8x96xf32>
    %130 = arith.addf %129, %128 : vector<8x96xf32>
    %131 = arith.divf %129, %130 : vector<8x96xf32>
    %132 = vector.extract_strided_slice %125 {offsets = [0, 96], sizes = [8, 32], strides = [1, 1]} : vector<8x128xf32> to vector<8x32xf32>
    %133 = math.tanh %132 : vector<8x32xf32>
    %134 = vector.extract_strided_slice %131 {offsets = [0, 0], sizes = [8, 32], strides = [1, 1]} : vector<8x96xf32> to vector<8x32xf32>
    %135 = vector.extract_strided_slice %131 {offsets = [0, 32], sizes = [8, 32], strides = [1, 1]} : vector<8x96xf32> to vector<8x32xf32>
    %136 = vector.extract_strided_slice %131 {offsets = [0, 64], sizes = [8, 32], strides = [1, 1]} : vector<8x96xf32> to vector<8x32xf32>
    %137 = arith.mulf %135, %120 : vector<8x32xf32>
    %138 = arith.mulf %134, %133 : vector<8x32xf32>
    %139 = arith.addf %137, %138 : vector<8x32xf32>
    %140 = math.tanh %139 : vector<8x32xf32>
    %141 = arith.mulf %136, %140 : vector<8x32xf32>
    %142 = vector.extract_strided_slice %6 {offsets = [56, 0], sizes = [8, 128], strides = [1, 1]} : vector<64x128xf32> to vector<8x128xf32>
    %cst_23 = arith.constant dense<0.000000e+00> : vector<8x128xf32>
    %143 = tpu.matmul %141, %1, %cst_23 {dimension_numbers = #tpu.dot_dimension_numbers<[1], [0], [0], [1], [0, 0, 1, 1], [], []>} : vector<8x32xf32>, vector<32x128xf32>, vector<8x128xf32> -> vector<8x128xf32>
    %144 = arith.addf %142, %143 : vector<8x128xf32>
    %145 = vector.extract_strided_slice %144 {offsets = [0, 0], sizes = [8, 96], strides = [1, 1]} : vector<8x128xf32> to vector<8x96xf32>
    %146 = arith.negf %145 : vector<8x96xf32>
    %147 = math.exp %146 : vector<8x96xf32>
    %cst_24 = arith.constant 1.000000e+00 : f32
    %148 = vector.broadcast %cst_24 : f32 to vector<8x96xf32>
    %149 = arith.addf %148, %147 : vector<8x96xf32>
    %150 = arith.divf %148, %149 : vector<8x96xf32>
    %151 = vector.extract_strided_slice %144 {offsets = [0, 96], sizes = [8, 32], strides = [1, 1]} : vector<8x128xf32> to vector<8x32xf32>
    %152 = math.tanh %151 : vector<8x32xf32>
    %153 = vector.extract_strided_slice %150 {offsets = [0, 0], sizes = [8, 32], strides = [1, 1]} : vector<8x96xf32> to vector<8x32xf32>
    %154 = vector.extract_strided_slice %150 {offsets = [0, 32], sizes = [8, 32], strides = [1, 1]} : vector<8x96xf32> to vector<8x32xf32>
    %155 = vector.extract_strided_slice %150 {offsets = [0, 64], sizes = [8, 32], strides = [1, 1]} : vector<8x96xf32> to vector<8x32xf32>
    %156 = arith.mulf %154, %139 : vector<8x32xf32>
    %157 = arith.mulf %153, %152 : vector<8x32xf32>
    %158 = arith.addf %156, %157 : vector<8x32xf32>
    %159 = math.tanh %158 : vector<8x32xf32>
    %160 = arith.mulf %155, %159 : vector<8x32xf32>
    %c0_25 = arith.constant 0 : index
    %c0_26 = arith.constant 0 : index
    %161 = vector.load %arg4[%c0_25, %c0_26] : memref<32x4xf32, #tpu.memory_space<vmem>>, vector<32x4xf32>
    %cst_27 = arith.constant dense<0.000000e+00> : vector<8x4xf32>
    %162 = tpu.matmul %160, %161, %cst_27 {dimension_numbers = #tpu.dot_dimension_numbers<[1], [0], [0], [1], [0, 0, 1, 1], [], []>} : vector<8x32xf32>, vector<32x4xf32>, vector<8x4xf32> -> vector<8x4xf32>
    %c0_28 = arith.constant 0 : index
    %c0_29 = arith.constant 0 : index
    %163 = vector.load %arg5[%c0_28, %c0_29] : memref<1x4xf32, #tpu.memory_space<vmem>>, vector<1x4xf32>
    %164 = vector.broadcast %163 : vector<1x4xf32> to vector<8x4xf32>
    %165 = arith.addf %162, %164 : vector<8x4xf32>
    %c0_30 = arith.constant 0 : index
    %c0_31 = arith.constant 0 : index
    %166 = vector.load %arg6[%c0_30, %c0_31] : memref<8x4xf32, #tpu.memory_space<vmem>>, vector<8x4xf32>
    tpu.vector_store %arg6[%c0_30, %c0_31], %165 {strides = array<i32>} : memref<8x4xf32, #tpu.memory_space<vmem>>, vector<8x4xf32>,
    return
  }
}

</mosaic_0001>

<bundles_post_ra>
// kernel: tpu_custom_call.1
= control target key start
LH: loop header
LB: loop body
LE: loop exit
PB: predicated region body
PF: predicated region fallthrough
CT: control target
= control target key end

     0   :  { %vm43_vm0 = vcmask 64512   ;;  %v1325_v0 = vmov 0.0   ;;  %vm1326_vm1 = vmmov 0   ;;  %s1327_s11 = smov 32   ;;  %vm173_vm2 = vcmask 261120   ;;  %s1589_s1 = inlined_call_operand.vmem [shape: f32[8,128], index: 1, kind: input, shape index: {}]   ;;  %s1590_s2 = inlined_call_operand.vmem [shape: f32[32,128], index: 2, kind: input, shape index: {}]   ;;  %s1591_s0 = inlined_call_operand.vmem [shape: f32[64,8], index: 0, kind: input, shape index: {}]   ;;  %s1592_s3 = inlined_call_operand.vmem [shape: f32[1,128], index: 3, kind: input, shape index: {}]   ;;  %s1593_s4 = inlined_call_operand.vmem [shape: f32[32,4], index: 4, kind: input, shape index: {}]   ;;  %s1594_s5 = inlined_call_operand.vmem [shape: f32[1,4], index: 5, kind: input, shape index: {}]   ;;  %s1595_s6 = inlined_call_operand.vmem [shape: f32[8,4], index: 6, kind: output, shape index: {}]  }
   0x1   :  { %1158 = vmatprep.subr.mxu1 %v1325_v0  ;;  %v23_v1 = vld [vmem:[%s1589_s1] sm:$0xff]  ;;  %v1371_v2 = vld [vmem:[%s1590_s2 + $0x18] sm:$0xff]  ;;  %1166 = vmatprep.mubr.msk.f32.mxu1 %vm1326_vm1, %v1325_v0  ;;  %v30_v4 = vld [vmem:[%s1591_s0 + $0x8] sm:$0xff]  ;;  %vm1058_vm3 = vcmask 31744  }
   0x2   :  { %v29_v3 = vld [vmem:[%s1591_s0] sm:$0xff]  ;;  %1144 = vmatprep.subr.mxu0 %v23_v1  ;;  %1159 = vmatpush3.msra.mxu1 %v1371_v2  ;;  %v1385_v5 = vld [vmem:[%s1590_s2 + $0x10] sm:$0xff]  ;;  %v1393_v6 = vld [vmem:[%s1590_s2 + $0x8] sm:$0xff] }
   0x3   :  { %1145 = vmatpush3.msra.mxu0 %v23_v1  ;;  %1146 = vmatprep.mubr.msk.f32.mxu0 %vm43_vm0, %v29_v3  ;;  %v1401_v7 = vld [vmem:[%s1590_s2] sm:$0xff]  ;;  %v31_v43 = vld [vmem:[%s1591_s0 + $0x10] sm:$0xff]  ;;  %v32_v44 = vld [vmem:[%s1591_s0 + $0x18] sm:$0xff] }
   0x4   :  { %1160 = vmatprep.subr.mxu1 %v1325_v0  ;;  %1147 = vmatmul.mubr.msk.f32.vlgmr.msra.gmra.mxu0 %vm43_vm0, %v30_v4  ;;  %v1429_v9 = vld [vmem:[%s1592_s3] ss:$0 sm:$0xff]  ;;  %s1328_s3 = smov 64   ;;  %v34_v46 = vld [vmem:[%s1591_s0 + $0x28] sm:$0xff]  ;;  %v35_v47 = vld [vmem:[%s1591_s0 + $0x30] sm:$0xff] }
   0x5   :  { %1161 = vmatpush3.msra.mxu1 %v1385_v5  ;;  %1180 = vmatprep.subr.mxu0 %v1325_v0  ;;  %v33_v45 = vld [vmem:[%s1591_s0 + $0x20] sm:$0xff]  ;;  %v36_v48 = vld [vmem:[%s1591_s0 + $0x38] sm:$0xff] }
   0x6   :  { %1162 = vmatprep.subr.mxu1 %v1325_v0  ;;  %1181 = vmatpush3.msra.mxu0 %v1371_v2 }
   0x7   :  { %1163 = vmatpush3.msra.mxu1 %v1393_v6  ;;  %1182 = vmatprep.subr.mxu0 %v1325_v0 }
   0x8   :  { %1164 = vmatprep.subr.mxu1 %v1325_v0  ;;  %1183 = vmatpush3.msra.mxu0 %v1385_v5 }
   0x9   :  { %1165 = vmatpush3.msra.mxu1 %v1401_v7  ;;  %1184 = vmatprep.subr.mxu0 %v1325_v0 }
   0xa   :  { %1167 = vmatmul.mubr.f32.vlgmr.msra.gmra.mxu1 %v1325_v0  ;;  %1169 = vmatprep.subr.mxu1 %v1325_v0 }
   0xb   :  { %1170 = vmatpush3.msra.mxu1 %v1371_v2  ;;  %1177 = vmatprep.mubr.msk.f32.mxu1 %vm1326_vm1, %v1325_v0 }
   0xc   :  { %1171 = vmatprep.subr.mxu1 %v1325_v0  ;;  %1185 = vmatpush3.msra.mxu0 %v1393_v6 }
   0xd   :  { %1172 = vmatpush3.msra.mxu1 %v1385_v5  ;;  %1186 = vmatprep.subr.mxu0 %v1325_v0 }
   0xe   :  { %1173 = vmatprep.subr.mxu1 %v1325_v0  ;;  %1187 = vmatpush3.msra.mxu0 %v1401_v7 }
   0xf   :  { %1174 = vmatpush3.msra.mxu1 %v1393_v6  ;;  %1202 = vmatprep.subr.mxu0 %v1325_v0 }
  0x10   :  { %1175 = vmatprep.subr.mxu1 %v1325_v0  ;;  %1149 = vmatprep.mubr.msk.f32.mxu0 %vm43_vm0, %v31_v43 }
  0x11   :  { %1176 = vmatpush3.msra.mxu1 %v1401_v7  ;;  %1150 = vmatmul.mubr.msk.f32.gmra.mxu0 %vm43_vm0, %v32_v44 }
  0x12   :  { %1191 = vmatprep.subr.mxu1 %v1325_v0  ;;  %1152 = vmatprep.mubr.msk.f32.mxu0 %vm43_vm0, %v33_v45 }
  0x15   :  { %1153 = vmatmul.mubr.msk.f32.gmra.mxu0 %vm43_vm0, %v34_v46 }
  0x16   :  { %1155 = vmatprep.mubr.msk.f32.mxu0 %vm43_vm0, %v35_v47 }
  0x19   :  { %1156 = vmatmul.mubr.msk.f32.gmra.mxu0 %vm43_vm0, %v36_v48 }
  0x1a   :  { %1188 = vmatprep.mubr.msk.f32.mxu0 %vm1326_vm1, %v1325_v0 }
  0xc4   :  { %v1148_v8 = vpop.f32.mrf.mxu0 }
  0xc5   :  { %v140_v29 = vadd.f32 %v1148_v8, %v1429_v9 }
  0xc6   :  { %v134_v10 = vpop.f32.mrf.mxu0 }
  0xc7   :  { %v135_v11 = vadd.f32 %v1429_v9, %v134_v10 }
  0xca   :  { %v243_v12 = vpop.f32.mrf.mxu1 }
  0xcb   :  { %v247_v13 = vadd.f32 %v243_v12, %v135_v11 }
  0xcc   :  { %v1168_v14 = vpop.f32.mrf.mxu1 }
  0xcd   :  { %1261 = vtanh.f32 %v247_v13  ;;  %v1073_v16 = vmul.f32 -1.442695, %v247_v13 }
  0xcf   :  { %1263 = vpow2.f32 %v1073_v16 }
  0xd1   :  { %v1151_v53 = vpop.f32.mrf.mxu0 }
  0xd3   :  { %v144_v54 = vpop.f32.mrf.mxu0 }
  0xd4   :  { %v145_v59 = vadd.f32 %v1429_v9, %v144_v54 }
  0xd5   :  { %v1489_v55 = vpop.f32.mrf.mxu0 }
  0xd7   :  { %v1491_v56 = vpop.f32.mrf.mxu0 }
  0xd9   :  { %v1493_v57 = vpop.f32.mrf.mxu0 }
  0xda   :  { %v1262_v15 = vpop.eup %1261 }
  0xdb   :  { %257 = vrot.lane.b32.xlu0 %v1262_v15, %s1327_s11  ;;  %v1495_v58 = vpop.f32.mrf.mxu0 }
  0xdc   :  { %v1264_v17 = vpop.eup %1263 }
  0xdd   :  { %v251_v18 = vadd.f32 1.0, %v1264_v17 }
  0xdf   :  { %1265 = vrcp.f32 %v251_v18 }
  0xec   :  { %v1266_v19 = vpop.eup %1265 }
  0xed   :  { %v255_v22 = vmul.f32 0.0, %v1266_v19 }
 0x14d   :  { %v258_v20 = vpop.permute.xlu0 %257 }
 0x14e   :  { %v260_v21 = vmul.f32 %v1266_v19, %v258_v20 }
 0x150   :  { %262 = vrot.lane.b32.xlu0 %v260_v21, %s1327_s11 }
 0x1c2   :  { %v263_v23 = vpop.permute.xlu0 %262 }
 0x1c3   :  { %v265_v24 = vadd.f32 %v263_v23, %v255_v22 }
 0x1c5   :  { %1267 = vtanh.f32 %v265_v24 }
 0x1d2   :  { %v1268_v25 = vpop.eup %1267 }
 0x1d3   :  { %268 = vrot.lane.b32.xlu1 %v1268_v25, %s1327_s11 }
 0x245   :  { %v269_v26 = vpop.permute.xlu1 %268 }
 0x246   :  { %v271_v27 = vmul.f32 %v1266_v19, %v269_v26  ;;  %v150_v19 = vadd.f32 %v1151_v53, %v1429_v9 }
 0x248   :  { %273 = vrot.lane.b32.xlu1 %v271_v27, %s1328_s3 }
 0x2ba   :  { %v274_v28 = vpop.permute.xlu1 %273 }
 0x2bb   :  { %1178 = vmatmul.mubr.msk.f32.vlgmr.msra.gmra.mxu1 %vm173_vm2, %v274_v28 }
 0x2bc   :  { %1192 = vmatpush3.msra.mxu1 %v1371_v2  ;;  %1199 = vmatprep.mubr.msk.f32.mxu1 %vm1326_vm1, %v1325_v0 }
 0x2bd   :  { %1193 = vmatprep.subr.mxu1 %v1325_v0 }
 0x2be   :  { %1194 = vmatpush3.msra.mxu1 %v1385_v5 }
 0x2bf   :  { %1195 = vmatprep.subr.mxu1 %v1325_v0 }
 0x2c0   :  { %1196 = vmatpush3.msra.mxu1 %v1393_v6 }
 0x2c1   :  { %1197 = vmatprep.subr.mxu1 %v1325_v0 }
 0x2c2   :  { %1198 = vmatpush3.msra.mxu1 %v1401_v7 }
 0x2c3   :  { %1213 = vmatprep.subr.mxu1 %v1325_v0 }
 0x37b   :  { %v343_v30 = vpop.f32.mrf.mxu1 }
 0x37c   :  { %v347_v31 = vadd.f32 %v343_v30, %v140_v29 }
 0x37d   :  { %v1179_v32 = vpop.f32.mrf.mxu1 }
 0x37e   :  { %1269 = vtanh.f32 %v347_v31  ;;  %v1075_v34 = vmul.f32 -1.442695, %v347_v31 }
 0x380   :  { %1271 = vpow2.f32 %v1075_v34 }
 0x38b   :  { %v1270_v33 = vpop.eup %1269 }
 0x38c   :  { %357 = vrot.lane.b32.xlu0 %v1270_v33, %s1327_s11 }
 0x38d   :  { %v1272_v35 = vpop.eup %1271 }
 0x38e   :  { %v351_v36 = vadd.f32 1.0, %v1272_v35 }
 0x390   :  { %1273 = vrcp.f32 %v351_v36 }
 0x39d   :  { %v1274_v37 = vpop.eup %1273 }
 0x39e   :  { %v355_v40 = vmul.f32 %v1274_v37, %v265_v24 }
 0x3fe   :  { %v358_v38 = vpop.permute.xlu0 %357 }
 0x3ff   :  { %v360_v39 = vmul.f32 %v1274_v37, %v358_v38 }
 0x401   :  { %362 = vrot.lane.b32.xlu1 %v360_v39, %s1327_s11 }
 0x473   :  { %v363_v41 = vpop.permute.xlu1 %362 }
 0x474   :  { %v365_v42 = vadd.f32 %v363_v41, %v355_v40 }
 0x476   :  { %1275 = vtanh.f32 %v365_v42 }
 0x483   :  { %v1276_v49 = vpop.eup %1275 }
 0x484   :  { %368 = vrot.lane.b32.xlu0 %v1276_v49, %s1327_s11 }
 0x4f6   :  { %v369_v50 = vpop.permute.xlu0 %368 }
 0x4f7   :  { %v371_v51 = vmul.f32 %v1274_v37, %v369_v50  ;;  %v155_v37 = vadd.f32 %v1429_v9, %v1491_v56  ;;  %v160_v56 = vadd.f32 %v1489_v55, %v1429_v9 }
 0x4f9   :  { %373 = vrot.lane.b32.xlu1 %v371_v51, %s1328_s3 }
 0x56b   :  { %v374_v52 = vpop.permute.xlu1 %373 }
 0x56c   :  { %1189 = vmatmul.mubr.msk.f32.vlgmr.msra.gmra.mxu0 %vm173_vm2, %v374_v52 }
 0x56d   :  { %1203 = vmatpush3.msra.mxu0 %v1371_v2  ;;  %1210 = vmatprep.mubr.msk.f32.mxu0 %vm1326_vm1, %v1325_v0 }
 0x56e   :  { %1204 = vmatprep.subr.mxu0 %v1325_v0 }
 0x56f   :  { %1205 = vmatpush3.msra.mxu0 %v1385_v5 }
 0x570   :  { %1206 = vmatprep.subr.mxu0 %v1325_v0 }
 0x571   :  { %1207 = vmatpush3.msra.mxu0 %v1393_v6 }
 0x572   :  { %1208 = vmatprep.subr.mxu0 %v1325_v0 }
 0x573   :  { %1209 = vmatpush3.msra.mxu0 %v1401_v7 }
 0x574   :  { %1224 = vmatprep.subr.mxu0 %v1325_v0 }
 0x62c   :  { %v443_v60 = vpop.f32.mrf.mxu0 }
 0x62d   :  { %v447_v61 = vadd.f32 %v443_v60, %v145_v59 }
 0x62e   :  { %v1190_v62 = vpop.f32.mrf.mxu0 }
 0x62f   :  { %1277 = vtanh.f32 %v447_v61  ;;  %v1077_v1 = vmul.f32 -1.442695, %v447_v61 }
 0x631   :  { %1279 = vpow2.f32 %v1077_v1 }
 0x63c   :  { %v1278_v63 = vpop.eup %1277 }
 0x63d   :  { %457 = vrot.lane.b32.xlu0 %v1278_v63, %s1327_s11 }
 0x63e   :  { %v1280_v3 = vpop.eup %1279 }
 0x63f   :  { %v451_v4 = vadd.f32 1.0, %v1280_v3 }
 0x641   :  { %1281 = vrcp.f32 %v451_v4 }
 0x64e   :  { %v1282_v8 = vpop.eup %1281 }
 0x64f   :  { %v455_v12 = vmul.f32 %v1282_v8, %v365_v42 }
 0x6af   :  { %v458_v10 = vpop.permute.xlu0 %457 }
 0x6b0   :  { %v460_v11 = vmul.f32 %v1282_v8, %v458_v10 }
 0x6b2   :  { %462 = vrot.lane.b32.xlu1 %v460_v11, %s1327_s11 }
 0x724   :  { %v463_v13 = vpop.permute.xlu1 %462 }
 0x725   :  { %v465_v14 = vadd.f32 %v463_v13, %v455_v12  ;;  %v165_v13 = vadd.f32 %v1429_v9, %v1495_v58 }
 0x727   :  { %1283 = vtanh.f32 %v465_v14 }
 0x734   :  { %v1284_v15 = vpop.eup %1283 }
 0x735   :  { %468 = vrot.lane.b32.xlu0 %v1284_v15, %s1327_s11 }
 0x7a7   :  { %v469_v16 = vpop.permute.xlu0 %468 }
 0x7a8   :  { %v471_v17 = vmul.f32 %v1282_v8, %v469_v16 }
 0x7aa   :  { %473 = vrot.lane.b32.xlu1 %v471_v17, %s1328_s3 }
 0x81c   :  { %v474_v18 = vpop.permute.xlu1 %473 }
 0x81d   :  { %1200 = vmatmul.mubr.msk.f32.vlgmr.msra.gmra.mxu1 %vm173_vm2, %v474_v18 }
 0x81e   :  { %1214 = vmatpush3.msra.mxu1 %v1371_v2  ;;  %1221 = vmatprep.mubr.msk.f32.mxu1 %vm1326_vm1, %v1325_v0 }
 0x81f   :  { %1215 = vmatprep.subr.mxu1 %v1325_v0 }
 0x820   :  { %1216 = vmatpush3.msra.mxu1 %v1385_v5 }
 0x821   :  { %1217 = vmatprep.subr.mxu1 %v1325_v0 }
 0x822   :  { %1218 = vmatpush3.msra.mxu1 %v1393_v6 }
 0x823   :  { %1219 = vmatprep.subr.mxu1 %v1325_v0 }
 0x824   :  { %1220 = vmatpush3.msra.mxu1 %v1401_v7 }
 0x825   :  { %1235 = vmatprep.subr.mxu1 %v1325_v0 }
 0x8dd   :  { %v543_v20 = vpop.f32.mrf.mxu1 }
 0x8de   :  { %v547_v21 = vadd.f32 %v543_v20, %v150_v19 }
 0x8df   :  { %v1201_v22 = vpop.f32.mrf.mxu1 }
 0x8e0   :  { %1285 = vtanh.f32 %v547_v21  ;;  %v1079_v24 = vmul.f32 -1.442695, %v547_v21 }
 0x8e2   :  { %1287 = vpow2.f32 %v1079_v24 }
 0x8ed   :  { %v1286_v23 = vpop.eup %1285 }
 0x8ee   :  { %557 = vrot.lane.b32.xlu0 %v1286_v23, %s1327_s11 }
 0x8ef   :  { %v1288_v25 = vpop.eup %1287 }
 0x8f0   :  { %v551_v26 = vadd.f32 1.0, %v1288_v25 }
 0x8f2   :  { %1289 = vrcp.f32 %v551_v26 }
 0x8ff   :  { %v1290_v27 = vpop.eup %1289 }
 0x900   :  { %v555_v30 = vmul.f32 %v1290_v27, %v465_v14 }
 0x960   :  { %v558_v28 = vpop.permute.xlu0 %557 }
 0x961   :  { %v560_v29 = vmul.f32 %v1290_v27, %v558_v28 }
 0x963   :  { %562 = vrot.lane.b32.xlu1 %v560_v29, %s1327_s11 }
 0x9d5   :  { %v563_v31 = vpop.permute.xlu1 %562 }
 0x9d6   :  { %v565_v32 = vadd.f32 %v563_v31, %v555_v30  ;;  %v170_v30 = vadd.f32 %v1493_v57, %v1429_v9  ;;  %v975_v57 = vld [vmem:[%s1593_s4 + $0x18] sm:$0xff] }
 0x9d8   :  { %1291 = vtanh.f32 %v565_v32 }
 0x9e5   :  { %v1292_v33 = vpop.eup %1291 }
 0x9e6   :  { %568 = vrot.lane.b32.xlu0 %v1292_v33, %s1327_s11 }
 0xa58   :  { %v569_v34 = vpop.permute.xlu0 %568 }
 0xa59   :  { %v571_v35 = vmul.f32 %v1290_v27, %v569_v34 }
 0xa5b   :  { %573 = vrot.lane.b32.xlu1 %v571_v35, %s1328_s3 }
 0xacd   :  { %v574_v36 = vpop.permute.xlu1 %573 }
 0xace   :  { %1211 = vmatmul.mubr.msk.f32.vlgmr.msra.gmra.mxu0 %vm173_vm2, %v574_v36 }
 0xacf   :  { %1225 = vmatpush3.msra.mxu0 %v1371_v2  ;;  %1232 = vmatprep.mubr.msk.f32.mxu0 %vm1326_vm1, %v1325_v0 }
 0xad0   :  { %1226 = vmatprep.subr.mxu0 %v1325_v0 }
 0xad1   :  { %1227 = vmatpush3.msra.mxu0 %v1385_v5 }
 0xad2   :  { %1228 = vmatprep.subr.mxu0 %v1325_v0 }
 0xad3   :  { %1229 = vmatpush3.msra.mxu0 %v1393_v6 }
 0xad4   :  { %1230 = vmatprep.subr.mxu0 %v1325_v0 }
 0xad5   :  { %1231 = vmatpush3.msra.mxu0 %v1401_v7 }
 0xad6   :  { %1246 = vmatprep.subr.mxu0 %v1325_v0 }
 0xb8e   :  { %v643_v38 = vpop.f32.mrf.mxu0 }
 0xb8f   :  { %v647_v39 = vadd.f32 %v643_v38, %v155_v37 }
 0xb90   :  { %v1212_v40 = vpop.f32.mrf.mxu0 }
 0xb91   :  { %1293 = vtanh.f32 %v647_v39  ;;  %v1081_v42 = vmul.f32 -1.442695, %v647_v39 }
 0xb93   :  { %1295 = vpow2.f32 %v1081_v42 }
 0xb9e   :  { %v1294_v41 = vpop.eup %1293 }
 0xb9f   :  { %657 = vrot.lane.b32.xlu0 %v1294_v41, %s1327_s11 }
 0xba0   :  { %v1296_v43 = vpop.eup %1295 }
 0xba1   :  { %v651_v44 = vadd.f32 1.0, %v1296_v43  ;;  %v974_v43 = vld [vmem:[%s1593_s4 + $0x10] sm:$0xff] }
 0xba3   :  { %1297 = vrcp.f32 %v651_v44  ;;  %v973_v44 = vld [vmem:[%s1593_s4 + $0x8] sm:$0xff] }
 0xbb0   :  { %v1298_v45 = vpop.eup %1297 }
 0xbb1   :  { %v655_v48 = vmul.f32 %v1298_v45, %v565_v32 }
 0xc11   :  { %v658_v46 = vpop.permute.xlu0 %657 }
 0xc12   :  { %v660_v47 = vmul.f32 %v1298_v45, %v658_v46 }
 0xc14   :  { %662 = vrot.lane.b32.xlu1 %v660_v47, %s1327_s11 }
 0xc86   :  { %v663_v49 = vpop.permute.xlu1 %662 }
 0xc87   :  { %v665_v50 = vadd.f32 %v663_v49, %v655_v48 }
 0xc89   :  { %1299 = vtanh.f32 %v665_v50 }
 0xc96   :  { %v1300_v51 = vpop.eup %1299 }
 0xc97   :  { %668 = vrot.lane.b32.xlu0 %v1300_v51, %s1327_s11 }
 0xd09   :  { %v669_v52 = vpop.permute.xlu0 %668 }
 0xd0a   :  { %v671_v53 = vmul.f32 %v1298_v45, %v669_v52  ;;  %v972_v45 = vld [vmem:[%s1593_s4] sm:$0xff] }
 0xd0c   :  { %673 = vrot.lane.b32.xlu1 %v671_v53, %s1328_s3 }
 0xd7e   :  { %v674_v54 = vpop.permute.xlu1 %673 }
 0xd7f   :  { %1222 = vmatmul.mubr.msk.f32.vlgmr.msra.gmra.mxu1 %vm173_vm2, %v674_v54 }
 0xd80   :  { %1236 = vmatpush3.msra.mxu1 %v1371_v2  ;;  %1243 = vmatprep.mubr.msk.f32.mxu1 %vm1326_vm1, %v1325_v0 }
 0xd81   :  { %1237 = vmatprep.subr.mxu1 %v1325_v0 }
 0xd82   :  { %1238 = vmatpush3.msra.mxu1 %v1385_v5 }
 0xd83   :  { %1239 = vmatprep.subr.mxu1 %v1325_v0 }
 0xd84   :  { %1240 = vmatpush3.msra.mxu1 %v1393_v6 }
 0xd85   :  { %1241 = vmatprep.subr.mxu1 %v1325_v0 }
 0xd86   :  { %1242 = vmatpush3.msra.mxu1 %v1401_v7 }
 0xe3f   :  { %v743_v59 = vpop.f32.mrf.mxu1 }
 0xe40   :  { %v747_v2 = vadd.f32 %v743_v59, %v160_v56 }
 0xe41   :  { %v1223_v60 = vpop.f32.mrf.mxu1 }
 0xe42   :  { %1301 = vtanh.f32 %v747_v2  ;;  %v1083_v62 = vmul.f32 -1.442695, %v747_v2 }
 0xe44   :  { %1303 = vpow2.f32 %v1083_v62 }
 0xe4f   :  { %v1302_v61 = vpop.eup %1301 }
 0xe50   :  { %757 = vrot.lane.b32.xlu0 %v1302_v61, %s1327_s11 }
 0xe51   :  { %v1304_v5 = vpop.eup %1303 }
 0xe52   :  { %v751_v63 = vadd.f32 1.0, %v1304_v5 }
 0xe54   :  { %1305 = vrcp.f32 %v751_v63 }
 0xe61   :  { %v1306_v6 = vpop.eup %1305 }
 0xe62   :  { %v755_v7 = vmul.f32 %v1306_v6, %v665_v50  ;;  %v1088_v50 = vld [vmem:[%s1594_s5] ss:$0 sm:$0xff] }
 0xec2   :  { %v758_v1 = vpop.permute.xlu0 %757 }
 0xec3   :  { %v760_v3 = vmul.f32 %v1306_v6, %v758_v1 }
 0xec5   :  { %762 = vrot.lane.b32.xlu1 %v760_v3, %s1327_s11 }
 0xf37   :  { %v763_v4 = vpop.permute.xlu1 %762 }
 0xf38   :  { %v765_v55 = vadd.f32 %v763_v4, %v755_v7 }
 0xf3a   :  { %1307 = vtanh.f32 %v765_v55 }
 0xf47   :  { %v1308_v8 = vpop.eup %1307 }
 0xf48   :  { %768 = vrot.lane.b32.xlu0 %v1308_v8, %s1327_s11 }
 0xfba   :  { %v769_v10 = vpop.permute.xlu0 %768 }
 0xfbb   :  { %v771_v11 = vmul.f32 %v1306_v6, %v769_v10 }
 0xfbd   :  { %773 = vrot.lane.b32.xlu1 %v771_v11, %s1328_s3 }
0x102f   :  { %v774_v12 = vpop.permute.xlu1 %773 }
0x1030   :  { %1233 = vmatmul.mubr.msk.f32.vlgmr.msra.gmra.mxu0 %vm173_vm2, %v774_v12 }
0x1031   :  { %1254 = vmatprep.mubr.msk.f32.mxu0 %vm1326_vm1, %v1325_v0  ;;  %1247 = vmatpush3.msra.mxu0 %v975_v57 }
0x1032   :  { %1248 = vmatprep.subr.mxu0 %v1325_v0 }
0x1033   :  { %1249 = vmatpush3.msra.mxu0 %v974_v43 }
0x1034   :  { %1250 = vmatprep.subr.mxu0 %v1325_v0 }
0x1035   :  { %1251 = vmatpush3.msra.mxu0 %v973_v44 }
0x1036   :  { %1252 = vmatprep.subr.mxu0 %v1325_v0 }
0x1037   :  { %1253 = vmatpush3.msra.mxu0 %v972_v45 }
0x10f0   :  { %v843_v14 = vpop.f32.mrf.mxu0 }
0x10f1   :  { %v847_v15 = vadd.f32 %v843_v14, %v165_v13 }
0x10f2   :  { %v1234_v16 = vpop.f32.mrf.mxu0 }
0x10f3   :  { %1309 = vtanh.f32 %v847_v15  ;;  %v1085_v18 = vmul.f32 -1.442695, %v847_v15 }
0x10f5   :  { %1311 = vpow2.f32 %v1085_v18 }
0x1100   :  { %v1310_v17 = vpop.eup %1309 }
0x1101   :  { %857 = vrot.lane.b32.xlu0 %v1310_v17, %s1327_s11 }
0x1102   :  { %v1312_v19 = vpop.eup %1311 }
0x1103   :  { %v851_v20 = vadd.f32 1.0, %v1312_v19 }
0x1105   :  { %1313 = vrcp.f32 %v851_v20 }
0x1112   :  { %v1314_v21 = vpop.eup %1313 }
0x1113   :  { %v855_v24 = vmul.f32 %v1314_v21, %v765_v55 }
0x1173   :  { %v858_v22 = vpop.permute.xlu0 %857 }
0x1174   :  { %v860_v23 = vmul.f32 %v1314_v21, %v858_v22 }
0x1176   :  { %862 = vrot.lane.b32.xlu1 %v860_v23, %s1327_s11 }
0x11e8   :  { %v863_v25 = vpop.permute.xlu1 %862 }
0x11e9   :  { %v865_v58 = vadd.f32 %v863_v25, %v855_v24 }
0x11eb   :  { %1315 = vtanh.f32 %v865_v58 }
0x11f8   :  { %v1316_v26 = vpop.eup %1315 }
0x11f9   :  { %868 = vrot.lane.b32.xlu0 %v1316_v26, %s1327_s11 }
0x126b   :  { %v869_v27 = vpop.permute.xlu0 %868 }
0x126c   :  { %v871_v28 = vmul.f32 %v1314_v21, %v869_v27 }
0x126e   :  { %873 = vrot.lane.b32.xlu1 %v871_v28, %s1328_s3 }
0x12e0   :  { %v874_v29 = vpop.permute.xlu1 %873 }
0x12e1   :  { %1244 = vmatmul.mubr.msk.f32.vlgmr.msra.gmra.mxu1 %vm173_vm2, %v874_v29 }
0x13a1   :  { %v943_v31 = vpop.f32.mrf.mxu1 }
0x13a2   :  { %v947_v32 = vadd.f32 %v943_v31, %v170_v30 }
0x13a3   :  { %v1245_v33 = vpop.f32.mrf.mxu1 }
0x13a4   :  { %1317 = vtanh.f32 %v947_v32  ;;  %v1087_v35 = vmul.f32 -1.442695, %v947_v32 }
0x13a6   :  { %1319 = vpow2.f32 %v1087_v35 }
0x13b1   :  { %v1318_v34 = vpop.eup %1317 }
0x13b2   :  { %957 = vrot.lane.b32.xlu0 %v1318_v34, %s1327_s11 }
0x13b3   :  { %v1320_v36 = vpop.eup %1319 }
0x13b4   :  { %v951_v37 = vadd.f32 1.0, %v1320_v36 }
0x13b6   :  { %1321 = vrcp.f32 %v951_v37 }
0x13c3   :  { %v1322_v38 = vpop.eup %1321 }
0x13c4   :  { %v955_v41 = vmul.f32 %v1322_v38, %v865_v58 }
0x1424   :  { %v958_v39 = vpop.permute.xlu0 %957 }
0x1425   :  { %v960_v40 = vmul.f32 %v1322_v38, %v958_v39 }
0x1427   :  { %962 = vrot.lane.b32.xlu1 %v960_v40, %s1327_s11 }
0x1499   :  { %v963_v42 = vpop.permute.xlu1 %962 }
0x149a   :  { %v965_v9 = vadd.f32 %v963_v42, %v955_v41 }
0x149c   :  { %1323 = vtanh.f32 %v965_v9 }
0x14a9   :  { %v1324_v46 = vpop.eup %1323 }
0x14aa   :  { %968 = vrot.lane.b32.xlu0 %v1324_v46, %s1327_s11 }
0x151c   :  { %v969_v47 = vpop.permute.xlu0 %968 }
0x151d   :  { %v971_v48 = vmul.f32 %v1322_v38, %v969_v47 }
0x151f   :  { %984 = vrot.lane.b32.xlu1 %v971_v48, %s1328_s3 }
0x1591   :  { %v985_v49 = vpop.permute.xlu1 %984 }
0x1592   :  { %1255 = vmatmul.mubr.msk.f32.vlgmr.msra.gmra.mxu0 %vm173_vm2, %v985_v49 }
0x1652   :  { %v1054_v51 = vpop.f32.mrf.mxu0 }
0x1653   :  { %v1055_v52 = vadd.f32 %v1088_v50, %v1054_v51 }
0x1654   :  { %v1256_v53 = vpop.f32.mrf.mxu0 }
0x1655   :  { %1059 = vst.msk [vmem:[%s1595_s6] sm:$0xff] %vm1058_vm3, %v1055_v52 }

</bundles_post_ra>
